<compile_context>
chip_gen: v7x
topology: tpu7x:2x2x1
jax: 0.10.0
libtpu: 0.0.40
codegen_flags: <defaults>
</compile_context>

<pallas_src>
import jax
import jax.numpy as jnp
from jax.experimental import pallas as pl
from jax.experimental.pallas import tpu as pltpu


HIDDEN = 128
N_CLASSES = 26

# Graph batches with at most this many nodes run as ONE fused pallas_call.
SMALL_MAX_NODES = 512
# Tiled-path tile sizes: row tile / contraction tile of A_hat.
TM = 512      # >= 2 row tiles whenever the tiled path is taken (v7x megacore)
TK = 1024     # contraction depth >= 256 keeps the 256-deep MXU full (v6e/v7x)


def _round_up(x, m):
    return ((x + m - 1) // m) * m


def _vmem_limit(nbytes):
    # Real buffered footprint + ~50% headroom, floored at 16 MiB and capped at
    # v7x's 64 MiB physical VMEM (v5e/v6e have 128 MiB, so the cap is safe).
    return int(min(max(int(1.5 * nbytes), 16 * 1024 * 1024), 64 * 1024 * 1024))


# ----------------------------------------------------------------------------
# Kernels
# ----------------------------------------------------------------------------
def _fused_small_kernel(a_ref, x_ref, p_ref, w1_ref, b1_ref, w2_ref, b2_ref,
                        wo_ref, bo_ref, o_ref):
    """Whole forward for a small padded graph batch, everything VMEM-resident.

        H1    = relu(A_hat @ (X  @ W1) + b1)
        H2    = relu(A_hat @ (H1 @ W2) + b2)
        probs = softmax((P @ H2) @ Wo + bo)

    bf16 MXU inputs with f32 accumulation for the big matmuls; the pool,
    output Linear and softmax stay entirely in f32 (tiny).
    """
    a = a_ref[...]                                                  # (n, n) bf16
    xw1 = jnp.dot(x_ref[...], w1_ref[...],
                  preferred_element_type=jnp.float32)               # (n, h) f32
    h1 = jnp.maximum(
        jnp.dot(a, xw1.astype(jnp.bfloat16),
                preferred_element_type=jnp.float32) + b1_ref[...], 0.0)
    xw2 = jnp.dot(h1.astype(jnp.bfloat16), w2_ref[...],
                  preferred_element_type=jnp.float32)
    h2 = jnp.maximum(
        jnp.dot(a, xw2.astype(jnp.bfloat16),
                preferred_element_type=jnp.float32) + b2_ref[...], 0.0)
    pooled = jnp.dot(p_ref[...], h2, preferred_element_type=jnp.float32)
    logits = jnp.dot(pooled, wo_ref[...],
                     preferred_element_type=jnp.float32) + bo_ref[...]
    m = jnp.max(logits, axis=-1, keepdims=True)
    e = jnp.exp(logits - m)
    o_ref[...] = e / jnp.sum(e, axis=-1, keepdims=True)


def _gcn_layer_kernel(a_ref, x_ref, w_ref, b_ref, h_ref, acc_ref):
    """H[i] = relu( sum_k A_hat[i, k] @ (X[k] @ W) + b ), grid = (i, k).

    X@W is fused here (no XW HBM round trip).  X is a VMEM-resident input
    (constant index_map) sliced per contraction tile, so it is DMA'd once,
    not once per row tile.  i is 'parallel' (megacore-safe: no cross-i state).
    """
    k = pl.program_id(1)

    @pl.when(k == 0)
    def _():
        acc_ref[...] = jnp.zeros_like(acc_ref)

    tk = a_ref.shape[1]
    off = pl.multiple_of(k * tk, tk)
    xw = jnp.dot(x_ref[pl.ds(off, tk), :], w_ref[...],
                 preferred_element_type=jnp.float32)                # (tk, h)
    acc_ref[...] += jnp.dot(a_ref[...], xw.astype(jnp.bfloat16),
                            preferred_element_type=jnp.float32)     # (tm, h)

    @pl.when(k == pl.num_programs(1) - 1)
    def _():
        h_ref[...] = jnp.maximum(acc_ref[...] + b_ref[...],
                                 0.0).astype(h_ref.dtype)


def _gcn_layer_pool_kernel(a_ref, x_ref, w_ref, b_ref, p_ref, pool_ref, acc_ref):
    """Layer-2 aggregation fused with the per-row-tile mean-pool partial:

        pool_parts[i] = P[:, i-tile] @ relu( sum_k A_hat[i,k] @ (H1[k]@W2) + b2 )

    H2 itself never goes back to HBM; each row tile writes its own partial
    (megacore-safe across the parallel i axis)."""
    k = pl.program_id(1)

    @pl.when(k == 0)
    def _():
        acc_ref[...] = jnp.zeros_like(acc_ref)

    tk = a_ref.shape[1]
    off = pl.multiple_of(k * tk, tk)
    xw = jnp.dot(x_ref[pl.ds(off, tk), :], w_ref[...],
                 preferred_element_type=jnp.float32)
    acc_ref[...] += jnp.dot(a_ref[...], xw.astype(jnp.bfloat16),
                            preferred_element_type=jnp.float32)

    @pl.when(k == pl.num_programs(1) - 1)
    def _():
        h2 = jnp.maximum(acc_ref[...] + b_ref[...], 0.0)            # (tm, h) f32
        pool_ref[0] = jnp.dot(p_ref[...], h2,
                              preferred_element_type=jnp.float32)   # (g, h) f32


def _head_kernel(pool_ref, wo_ref, bo_ref, o_ref):
    """Sum partial pooled vectors, output Linear + softmax (all f32, tiny)."""
    pooled = jnp.sum(pool_ref[...], axis=0)                         # (g, h) f32
    logits = jnp.dot(pooled, wo_ref[...],
                     preferred_element_type=jnp.float32) + bo_ref[...]
    m = jnp.max(logits, axis=-1, keepdims=True)
    e = jnp.exp(logits - m)
    o_ref[...] = e / jnp.sum(e, axis=-1, keepdims=True)


# ----------------------------------------------------------------------------
# pallas_call wrappers
# ----------------------------------------------------------------------------
def _forward_small(a_p, x_p, p_p, w1_p, b1_p, w2_p, b2_p, wo_p, bo_p):
    n_pad, f_pad = x_p.shape
    g_pad = p_p.shape[0]
    h = w1_p.shape[1]
    c_pad = wo_p.shape[1]
    # Operand bytes + allowance for a few (n_pad, h) f32 temporaries.
    buf = (a_p.size * 2 + x_p.size * 2 + p_p.size * 4
           + (w1_p.size + w2_p.size) * 2 + wo_p.size * 4
           + (b1_p.size + b2_p.size + bo_p.size) * 4
           + g_pad * c_pad * 4 + 4 * n_pad * h * 4)
    flops = (2 * n_pad * f_pad * h + 2 * n_pad * h * h
             + 2 * 2 * n_pad * n_pad * h
             + 2 * g_pad * n_pad * h + 2 * g_pad * h * c_pad)
    return pl.pallas_call(
        _fused_small_kernel,
        out_shape=jax.ShapeDtypeStruct((g_pad, c_pad), jnp.float32),
        compiler_params=pltpu.CompilerParams(vmem_limit_bytes=_vmem_limit(buf)),
        cost_estimate=pl.CostEstimate(flops=flops,
                                      transcendentals=g_pad * c_pad,
                                      bytes_accessed=buf),
    )(a_p, x_p, p_p, w1_p, b1_p, w2_p, b2_p, wo_p, bo_p)


def _gcn_layer_tiled(a_p, x_p, w_p, b_p, tm, tk):
    n_pad = a_p.shape[0]
    f_pad = x_p.shape[1]
    h = w_p.shape[1]
    buf = (2 * tm * tk * 2            # A tile (double-buffered, bf16)
           + 2 * n_pad * f_pad * 2    # resident X (budget x2 buffers)
           + 2 * f_pad * h * 2        # resident W
           + 2 * h * 4                # bias
           + 2 * tm * h * 2           # H output tile
           + tm * h * 4)              # f32 accumulator scratch
    return pl.pallas_call(
        _gcn_layer_kernel,
        out_shape=jax.ShapeDtypeStruct((n_pad, h), jnp.bfloat16),
        grid_spec=pltpu.PrefetchScalarGridSpec(
            num_scalar_prefetch=0,
            grid=(n_pad // tm, n_pad // tk),
            in_specs=[pl.BlockSpec((tm, tk), lambda i, k: (i, k)),
                      pl.BlockSpec((n_pad, f_pad), lambda i, k: (0, 0)),
                      pl.BlockSpec((f_pad, h), lambda i, k: (0, 0)),
                      pl.BlockSpec((1, h), lambda i, k: (0, 0))],
            out_specs=pl.BlockSpec((tm, h), lambda i, k: (i, 0)),
            scratch_shapes=[pltpu.VMEM((tm, h), jnp.float32)],
        ),
        compiler_params=pltpu.CompilerParams(
            dimension_semantics=("parallel", "arbitrary"),
            vmem_limit_bytes=_vmem_limit(buf)),
        cost_estimate=pl.CostEstimate(
            flops=2 * n_pad * n_pad * h
                  + (n_pad // tm) * 2 * n_pad * f_pad * h,
            transcendentals=0,
            bytes_accessed=2 * (n_pad * n_pad + n_pad * f_pad + f_pad * h
                                + n_pad * h) + 4 * h),
    )(a_p, x_p, w_p, b_p)


def _gcn_layer_pool_tiled(a_p, h1_p, w_p, b_p, p_p, tm, tk):
    n_pad = a_p.shape[0]
    h = w_p.shape[1]
    g_pad = p_p.shape[0]
    n_i = n_pad // tm
    buf = (2 * tm * tk * 2 + 2 * n_pad * h * 2 + 2 * h * h * 2 + 2 * h * 4
           + 2 * g_pad * tm * 4 + 2 * g_pad * h * 4 + tm * h * 4)
    return pl.pallas_call(
        _gcn_layer_pool_kernel,
        out_shape=jax.ShapeDtypeStruct((n_i, g_pad, h), jnp.float32),
        grid_spec=pltpu.PrefetchScalarGridSpec(
            num_scalar_prefetch=0,
            grid=(n_i, n_pad // tk),
            in_specs=[pl.BlockSpec((tm, tk), lambda i, k: (i, k)),
                      pl.BlockSpec((n_pad, h), lambda i, k: (0, 0)),
                      pl.BlockSpec((h, h), lambda i, k: (0, 0)),
                      pl.BlockSpec((1, h), lambda i, k: (0, 0)),
                      pl.BlockSpec((g_pad, tm), lambda i, k: (0, i))],
            out_specs=pl.BlockSpec((1, g_pad, h), lambda i, k: (i, 0, 0)),
            scratch_shapes=[pltpu.VMEM((tm, h), jnp.float32)],
        ),
        compiler_params=pltpu.CompilerParams(
            dimension_semantics=("parallel", "arbitrary"),
            vmem_limit_bytes=_vmem_limit(buf)),
        cost_estimate=pl.CostEstimate(
            flops=2 * n_pad * n_pad * h
                  + (n_pad // tm) * 2 * n_pad * h * h
                  + 2 * g_pad * n_pad * h,
            transcendentals=0,
            bytes_accessed=2 * (n_pad * n_pad + 2 * n_pad * h + h * h)
                           + 4 * (g_pad * n_pad + n_i * g_pad * h)),
    )(a_p, h1_p, w_p, b_p, p_p)


def _head(pool_parts, wo_p, bo_p):
    n_i, g_pad, h = pool_parts.shape
    c_pad = wo_p.shape[1]
    buf = (pool_parts.size + wo_p.size + bo_p.size + g_pad * c_pad) * 4
    return pl.pallas_call(
        _head_kernel,
        out_shape=jax.ShapeDtypeStruct((g_pad, c_pad), jnp.float32),
        compiler_params=pltpu.CompilerParams(vmem_limit_bytes=_vmem_limit(buf)),
        cost_estimate=pl.CostEstimate(
            flops=n_i * g_pad * h + 2 * g_pad * h * c_pad,
            transcendentals=g_pad * c_pad,
            bytes_accessed=buf),
    )(pool_parts, wo_p, bo_p)


# ----------------------------------------------------------------------------
# Forward pass
# ----------------------------------------------------------------------------
@jax.jit
def gnn_forward(a_hat, pool_mat, x, params):
    w1, b1, w2, b2, wo, bo = params
    n, f = x.shape
    g = pool_mat.shape[0]
    h = w1.shape[1]
    c = wo.shape[1]

    small = n <= SMALL_MAX_NODES
    if small:
        n_pad = _round_up(max(n, 128), 128)
        tm = tk = n_pad
    else:
        tm, tk = TM, TK
        n_pad = _round_up(n, tk)
    f_pad = _round_up(f, 128)
    c_pad = _round_up(c, 128)
    g_pad = _round_up(max(g, 8), 8)

    bf = jnp.bfloat16
    # Padded, lane-dense operands.  Padded A_hat / pool-matrix COLUMNS are
    # exactly zero, so padded node rows (which become relu(b) != 0) can never
    # reach a real output.
    a_p = jnp.zeros((n_pad, n_pad), bf).at[:n, :n].set(a_hat.astype(bf))
    x_p = jnp.zeros((n_pad, f_pad), bf).at[:n, :f].set(x.astype(bf))
    p_p = jnp.zeros((g_pad, n_pad), jnp.float32).at[:g, :n].set(
        pool_mat.astype(jnp.float32))
    w1_p = jnp.zeros((f_pad, h), bf).at[:f, :].set(w1.astype(bf))
    w2_p = w2.astype(bf)
    # Head stays f32 (tiny) -> no bf16 cast of pooled / Wo.
    wo_p = jnp.zeros((h, c_pad), jnp.float32).at[:, :c].set(wo.astype(jnp.float32))
    b1_p = b1.astype(jnp.float32).reshape(1, h)
    b2_p = b2.astype(jnp.float32).reshape(1, h)
    # Padded classes get a hugely negative bias (logits are f32, so this is
    # finite) -> exp() kills them inside the in-kernel softmax; the wrapper
    # slices the real columns back out.
    bo_p = jnp.full((1, c_pad), -1e30, jnp.float32).at[:, :c].set(
        bo.astype(jnp.float32).reshape(1, c))

    if small:
        probs = _forward_small(a_p, x_p, p_p, w1_p, b1_p, w2_p, b2_p, wo_p, bo_p)
    else:
        h1 = _gcn_layer_tiled(a_p, x_p, w1_p, b1_p, tm, tk)
        pool_parts = _gcn_layer_pool_tiled(a_p, h1, w2_p, b2_p, p_p, tm, tk)
        probs = _head(pool_parts, wo_p, bo_p)
    return probs[:g, :c]


# ----------------------------------------------------------------------------
# Pure-JAX reference (float32) for correctness checking
# ----------------------------------------------------------------------------
def gnn_forward_ref(a_hat, pool_mat, x, params):
    w1, b1, w2, b2, wo, bo = params
    h1 = jax.nn.relu(a_hat @ (x @ w1) + b1)
    h2 = jax.nn.relu(a_hat @ (h1 @ w2) + b2)
    pooled = pool_mat @ h2
    return jax.nn.softmax(pooled @ wo + bo, axis=-1)


# ----------------------------------------------------------------------------
# Glue: graph structure -> dense matrices (plain JAX, not the hot path)
# ----------------------------------------------------------------------------
def build_norm_adj(edge_index, num_nodes):
    """A_hat = D^{-1/2} (A + I) D^{-1/2}; A[i, j] += 1 per edge j -> i
    (duplicates accumulate, like PyG scatter-add); self-loops added only where
    missing (PyG add_remaining_self_loops)."""
    src, dst = edge_index[0], edge_index[1]
    a = jnp.zeros((num_nodes, num_nodes), jnp.float32).at[dst, src].add(1.0)
    diag = jnp.diagonal(a)
    a = a + jnp.diag(jnp.where(diag == 0, 1.0, 0.0))
    deg = jnp.sum(a, axis=1)
    dinv = jax.lax.rsqrt(jnp.maximum(deg, 1e-12))
    return a * dinv[:, None] * dinv[None, :]


def build_pool_matrix(batch, num_graphs):
    """P[g, i] = 1 / |{j : batch[j] == g}| if batch[i] == g else 0."""
    onehot = (batch[None, :] == jnp.arange(num_graphs)[:, None]).astype(jnp.float32)
    counts = jnp.sum(onehot, axis=1, keepdims=True)
    return onehot / jnp.maximum(counts, 1.0)


def init_params(key, node_features=54, hidden_dim=128, n_classes=26):
    k1, k2, k3 = jax.random.split(key, 3)
    scale = 0.1
    w1 = scale * jax.random.normal(k1, (node_features, hidden_dim), jnp.float32)
    b1 = jnp.zeros((1, hidden_dim), jnp.float32)
    w2 = scale * jax.random.normal(k2, (hidden_dim, hidden_dim), jnp.float32)
    b2 = jnp.zeros((1, hidden_dim), jnp.float32)
    wo = scale * jax.random.normal(k3, (hidden_dim, n_classes), jnp.float32)
    bo = jnp.zeros((1, n_classes), jnp.float32)
    return (w1, b1, w2, b2, wo, bo)


# ----------------------------------------------------------------------------
if __name__ == "__main__":
    key = jax.random.PRNGKey(0)
    k_x, k_e, k_p, k_x2, k_e2 = jax.random.split(key, 5)

    node_features = 54
    params = init_params(k_p, node_features, HIDDEN, N_CLASSES)

    def make_case(kx, ke, num_nodes, num_edges, num_graphs):
        x = jax.random.normal(kx, (num_nodes, node_features), jnp.float32)
        edge_index = jax.random.randint(ke, (2, num_edges), 0, num_nodes, jnp.int32)
        batch = (jnp.arange(num_nodes) * num_graphs // num_nodes).astype(jnp.int32)
        a_hat = build_norm_adj(edge_index, num_nodes)
        pool_mat = build_pool_matrix(batch, num_graphs)
        return a_hat, pool_mat, x

    # Case 1: tiny graph batch -> single fused pallas_call path.
    a_hat, pool_mat, x = make_case(k_x, k_e, num_nodes=16, num_edges=32, num_graphs=2)
    out = jax.block_until_ready(gnn_forward(a_hat, pool_mat, x, params))
    ref = gnn_forward_ref(a_hat, pool_mat, x, params)
    assert out.shape == (2, N_CLASSES)
    assert jnp.allclose(jnp.sum(out, axis=-1), 1.0, atol=1e-3)
    assert bool(jnp.all(out >= 0.0))
    assert jnp.allclose(out, ref, atol=3e-2)

    # Case 2: larger graph batch -> tiled fused (layer / layer+pool / head) path.
    a_hat2, pool_mat2, x2 = make_case(k_x2, k_e2, num_nodes=520, num_edges=2080,
                                      num_graphs=3)
    out2 = jax.block_until_ready(gnn_forward(a_hat2, pool_mat2, x2, params))
    ref2 = gnn_forward_ref(a_hat2, pool_mat2, x2, params)
    assert out2.shape == (3, N_CLASSES)
    assert jnp.allclose(jnp.sum(out2, axis=-1), 1.0, atol=1e-3)
    assert bool(jnp.all(out2 >= 0.0))
    assert jnp.allclose(out2, ref2, atol=3e-2)

    print("KERNEL_OK")
</pallas_src>

<mosaic_0001>
module attributes {stable_mosaic.version = 11 : i64} {
  func.func @_fused_small_kernel(%arg0: memref<128x128xbf16, #tpu.memory_space<vmem>>, %arg1: memref<128x128xbf16, #tpu.memory_space<vmem>>, %arg2: memref<8x128xf32, #tpu.memory_space<vmem>>, %arg3: memref<128x128xbf16, #tpu.memory_space<vmem>>, %arg4: memref<1x128xf32, #tpu.memory_space<vmem>>, %arg5: memref<128x128xbf16, #tpu.memory_space<vmem>>, %arg6: memref<1x128xf32, #tpu.memory_space<vmem>>, %arg7: memref<128x128xf32, #tpu.memory_space<vmem>>, %arg8: memref<1x128xf32, #tpu.memory_space<vmem>>, %arg9: memref<8x128xf32, #tpu.memory_space<vmem>>) attributes {dimension_semantics = [], scalar_prefetch = 0 : i64, scratch_operands = 0 : i64, tpu.core_type = #tpu.core_type<tc>} {
    %c0 = arith.constant 0 : index
    %c0_0 = arith.constant 0 : index
    %0 = vector.load %arg0[%c0, %c0_0] : memref<128x128xbf16, #tpu.memory_space<vmem>>, vector<128x128xbf16>
    %c0_1 = arith.constant 0 : index
    %c0_2 = arith.constant 0 : index
    %1 = vector.load %arg1[%c0_1, %c0_2] : memref<128x128xbf16, #tpu.memory_space<vmem>>, vector<128x128xbf16>
    %c0_3 = arith.constant 0 : index
    %c0_4 = arith.constant 0 : index
    %2 = vector.load %arg3[%c0_3, %c0_4] : memref<128x128xbf16, #tpu.memory_space<vmem>>, vector<128x128xbf16>
    %cst = arith.constant dense<0.000000e+00> : vector<128x128xf32>
    %3 = tpu.matmul %1, %2, %cst {dimension_numbers = #tpu.dot_dimension_numbers<[1], [0], [0], [1], [0, 0, 1, 1], [], []>} : vector<128x128xbf16>, vector<128x128xbf16>, vector<128x128xf32> -> vector<128x128xf32>
    %4 = arith.truncf %3 : vector<128x128xf32> to vector<128x128xbf16>
    %cst_5 = arith.constant dense<0.000000e+00> : vector<128x128xf32>
    %5 = tpu.matmul %0, %4, %cst_5 {dimension_numbers = #tpu.dot_dimension_numbers<[1], [0], [0], [1], [0, 0, 1, 1], [], []>} : vector<128x128xbf16>, vector<128x128xbf16>, vector<128x128xf32> -> vector<128x128xf32>
    %c0_6 = arith.constant 0 : index
    %c0_7 = arith.constant 0 : index
    %6 = vector.load %arg4[%c0_6, %c0_7] : memref<1x128xf32, #tpu.memory_space<vmem>>, vector<1x128xf32>
    %7 = vector.broadcast %6 : vector<1x128xf32> to vector<128x128xf32>
    %8 = arith.addf %5, %7 : vector<128x128xf32>
    %cst_8 = arith.constant 0.000000e+00 : f32
    %9 = vector.broadcast %cst_8 : f32 to vector<128x128xf32>
    %10 = arith.maximumf %8, %9 : vector<128x128xf32>
    %11 = arith.truncf %10 : vector<128x128xf32> to vector<128x128xbf16>
    %c0_9 = arith.constant 0 : index
    %c0_10 = arith.constant 0 : index
    %12 = vector.load %arg5[%c0_9, %c0_10] : memref<128x128xbf16, #tpu.memory_space<vmem>>, vector<128x128xbf16>
    %cst_11 = arith.constant dense<0.000000e+00> : vector<128x128xf32>
    %13 = tpu.matmul %11, %12, %cst_11 {dimension_numbers = #tpu.dot_dimension_numbers<[1], [0], [0], [1], [0, 0, 1, 1], [], []>} : vector<128x128xbf16>, vector<128x128xbf16>, vector<128x128xf32> -> vector<128x128xf32>
    %14 = arith.truncf %13 : vector<128x128xf32> to vector<128x128xbf16>
    %cst_12 = arith.constant dense<0.000000e+00> : vector<128x128xf32>
    %15 = tpu.matmul %0, %14, %cst_12 {dimension_numbers = #tpu.dot_dimension_numbers<[1], [0], [0], [1], [0, 0, 1, 1], [], []>} : vector<128x128xbf16>, vector<128x128xbf16>, vector<128x128xf32> -> vector<128x128xf32>
    %c0_13 = arith.constant 0 : index
    %c0_14 = arith.constant 0 : index
    %16 = vector.load %arg6[%c0_13, %c0_14] : memref<1x128xf32, #tpu.memory_space<vmem>>, vector<1x128xf32>
    %17 = vector.broadcast %16 : vector<1x128xf32> to vector<128x128xf32>
    %18 = arith.addf %15, %17 : vector<128x128xf32>
    %cst_15 = arith.constant 0.000000e+00 : f32
    %19 = vector.broadcast %cst_15 : f32 to vector<128x128xf32>
    %20 = arith.maximumf %18, %19 : vector<128x128xf32>
    %c0_16 = arith.constant 0 : index
    %c0_17 = arith.constant 0 : index
    %21 = vector.load %arg2[%c0_16, %c0_17] : memref<8x128xf32, #tpu.memory_space<vmem>>, vector<8x128xf32>
    %cst_18 = arith.constant dense<0.000000e+00> : vector<8x128xf32>
    %22 = tpu.matmul %21, %20, %cst_18 {dimension_numbers = #tpu.dot_dimension_numbers<[1], [0], [0], [1], [0, 0, 1, 1], [], []>} : vector<8x128xf32>, vector<128x128xf32>, vector<8x128xf32> -> vector<8x128xf32>
    %c0_19 = arith.constant 0 : index
    %c0_20 = arith.constant 0 : index
    %23 = vector.load %arg7[%c0_19, %c0_20] : memref<128x128xf32, #tpu.memory_space<vmem>>, vector<128x128xf32>
    %cst_21 = arith.constant dense<0.000000e+00> : vector<8x128xf32>
    %24 = tpu.matmul %22, %23, %cst_21 {dimension_numbers = #tpu.dot_dimension_numbers<[1], [0], [0], [1], [0, 0, 1, 1], [], []>} : vector<8x128xf32>, vector<128x128xf32>, vector<8x128xf32> -> vector<8x128xf32>
    %c0_22 = arith.constant 0 : index
    %c0_23 = arith.constant 0 : index
    %25 = vector.load %arg8[%c0_22, %c0_23] : memref<1x128xf32, #tpu.memory_space<vmem>>, vector<1x128xf32>
    %26 = vector.broadcast %25 : vector<1x128xf32> to vector<8x128xf32>
    %27 = arith.addf %24, %26 : vector<8x128xf32>
    %cst_24 = arith.constant dense<0xFF800000> : vector<8xf32>
    %28 = vector.multi_reduction <maximumf>, %27, %cst_24 [1] : vector<8x128xf32> to vector<8xf32>
    %29 = vector.shape_cast %28 : vector<8xf32> to vector<8x1xf32>
    %30 = vector.broadcast %29 : vector<8x1xf32> to vector<8x128xf32>
    %31 = arith.subf %27, %30 : vector<8x128xf32>
    %32 = math.exp %31 : vector<8x128xf32>
    %cst_25 = arith.constant dense<0.000000e+00> : vector<8xf32>
    %33 = vector.multi_reduction <add>, %32, %cst_25 [1] : vector<8x128xf32> to vector<8xf32>
    %34 = vector.shape_cast %33 : vector<8xf32> to vector<8x1xf32>
    %35 = vector.broadcast %34 : vector<8x1xf32> to vector<8x128xf32>
    %36 = arith.divf %32, %35 : vector<8x128xf32>
    %c0_26 = arith.constant 0 : index
    %c0_27 = arith.constant 0 : index
    %37 = vector.load %arg9[%c0_26, %c0_27] : memref<8x128xf32, #tpu.memory_space<vmem>>, vector<8x128xf32>
    tpu.vector_store %arg9[%c0_26, %c0_27], %36 {strides = array<i32>} : memref<8x128xf32, #tpu.memory_space<vmem>>, vector<8x128xf32>,
    return
  }
}

</mosaic_0001>

<bundles_post_ra>
// kernel: gnn_forward.1
= control target key start
LH: loop header
LB: loop body
LE: loop exit
PB: predicated region body
PF: predicated region fallthrough
CT: control target
= control target key end

     0   :  { %vm1344_vm0 = vmmov 0   ;;  %s1603_s3 = inlined_call_operand.vmem [shape: bf16[128,128], index: 3, kind: input, shape index: {}]   ;;  %s1604_s1 = inlined_call_operand.vmem [shape: bf16[128,128], index: 1, kind: input, shape index: {}]   ;;  %s1605_s0 = inlined_call_operand.vmem [shape: bf16[128,128], index: 0, kind: input, shape index: {}]   ;;  %s1606_s5 = inlined_call_operand.vmem [shape: bf16[128,128], index: 5, kind: input, shape index: {}]   ;;  %s1607_s4 = inlined_call_operand.vmem [shape: f32[1,128], index: 4, kind: input, shape index: {}]   ;;  %s1608_s7 = inlined_call_operand.vmem [shape: f32[128,128], index: 7, kind: input, shape index: {}]   ;;  %s1609_s6 = inlined_call_operand.vmem [shape: f32[1,128], index: 6, kind: input, shape index: {}]   ;;  %s1610_s2 = inlined_call_operand.vmem [shape: f32[8,128], index: 2, kind: input, shape index: {}]   ;;  %s1611_s8 = inlined_call_operand.vmem [shape: f32[1,128], index: 8, kind: input, shape index: {}]   ;;  %s1612_s9 = inlined_call_operand.vmem [shape: f32[8,128], index: 9, kind: output, shape index: {}]  }
   0x1   :  { %v1307_v0 = vld [vmem:[%s1603_s3] sm:$0xff]   ;;  %v1308_v1 = vld [vmem:[%s1603_s3 + $0x8] sm:$0xff]   ;;  %v1309_v2 = vld [vmem:[%s1603_s3 + $0x10] sm:$0xff]  }
   0x2   :  { %1058 = vmatprep.subr.bf16.mxu0 %v1307_v0  ;;  %v1310_v3 = vld [vmem:[%s1603_s3 + $0x18] sm:$0xff]   ;;  %v1315_v4 = vld [vmem:[%s1604_s1] sm:$0xff]   ;;  %v1312_v6 = vld [vmem:[%s1603_s3 + $0x28] sm:$0xff]  }
   0x3   :  { %1059 = vmatpush3.bf16.msra.mxu0 %v1307_v0  ;;  %1074 = vmatprep.mubr.bf16.mxu0 %v1315_v4  ;;  %v1311_v5 = vld [vmem:[%s1603_s3 + $0x20] sm:$0xff]   ;;  %v1313_v7 = vld [vmem:[%s1603_s3 + $0x30] sm:$0xff]   ;;  %v1314_v8 = vld [vmem:[%s1603_s3 + $0x38] sm:$0xff]  }
   0x4   :  { %1060 = vmatprep.subr.bf16.mxu0 %v1308_v1  ;;  %v1316_v9 = vld [vmem:[%s1604_s1 + $0x8] sm:$0xff]   ;;  %v1317_v10 = vld [vmem:[%s1604_s1 + $0x10] sm:$0xff]   ;;  %v1318_v11 = vld [vmem:[%s1604_s1 + $0x18] sm:$0xff]  }
   0x5   :  { %v1319_v12 = vld [vmem:[%s1604_s1 + $0x20] sm:$0xff]   ;;  %v1320_v13 = vld [vmem:[%s1604_s1 + $0x28] sm:$0xff]   ;;  %v1321_v14 = vld [vmem:[%s1604_s1 + $0x30] sm:$0xff]  }
   0x6   :  { %v1322_v15 = vld [vmem:[%s1604_s1 + $0x38] sm:$0xff]   ;;  %v1447_v16 = vld [vmem:[%s1605_s0] sm:$0xff]   ;;  %v1332_v18 = vld [vmem:[%s1606_s5 + $0x8] sm:$0xff]  }
   0x7   :  { %1061 = vmatpush3.bf16.msra.mxu0 %v1308_v1  ;;  %1106 = vmatprep.mubr.bf16.mxu1 %v1447_v16  ;;  %v1331_v17 = vld [vmem:[%s1606_s5] sm:$0xff]   ;;  %v1333_v19 = vld [vmem:[%s1606_s5 + $0x10] sm:$0xff]   ;;  %v1334_v20 = vld [vmem:[%s1606_s5 + $0x18] sm:$0xff]  }
   0x8   :  { %1062 = vmatprep.subr.bf16.mxu0 %v1309_v2  ;;  %v1335_v21 = vld [vmem:[%s1606_s5 + $0x20] sm:$0xff]   ;;  %v1336_v22 = vld [vmem:[%s1606_s5 + $0x28] sm:$0xff]   ;;  %v1476_v48 = vld [vmem:[%s1605_s0 + $0x10] sm:$0xff]  }
   0x9   :  { %v1471_v47 = vld [vmem:[%s1605_s0 + $0x8] sm:$0xff]   ;;  %v1483_v49 = vld [vmem:[%s1605_s0 + $0x18] sm:$0xff]   ;;  %v1488_v50 = vld [vmem:[%s1605_s0 + $0x20] sm:$0xff]  }
   0xa   :  { %v1495_v51 = vld [vmem:[%s1605_s0 + $0x28] sm:$0xff]   ;;  %v1500_v52 = vld [vmem:[%s1605_s0 + $0x30] sm:$0xff]   ;;  %v1507_v53 = vld [vmem:[%s1605_s0 + $0x38] sm:$0xff]  }
   0xb   :  { %1063 = vmatpush3.bf16.msra.mxu0 %v1309_v2  ;;  %v1337_v54 = vld [vmem:[%s1606_s5 + $0x30] sm:$0xff]   ;;  %v1338_v55 = vld [vmem:[%s1606_s5 + $0x38] sm:$0xff]   ;;  %v941_v56 = vld [vmem:[%s1607_s4] ss:$0 sm:$0xff] }
   0xc   :  { %1064 = vmatprep.subr.bf16.mxu0 %v1310_v3 }
   0xf   :  { %1065 = vmatpush3.bf16.msra.mxu0 %v1310_v3 }
  0x10   :  { %1066 = vmatprep.subr.bf16.mxu0 %v1311_v5 }
  0x13   :  { %1067 = vmatpush3.bf16.msra.mxu0 %v1311_v5 }
  0x14   :  { %1068 = vmatprep.subr.bf16.mxu0 %v1312_v6 }
  0x17   :  { %1069 = vmatpush3.bf16.msra.mxu0 %v1312_v6 }
  0x18   :  { %1070 = vmatprep.subr.bf16.mxu0 %v1313_v7 }
  0x1b   :  { %1071 = vmatpush3.bf16.msra.mxu0 %v1313_v7 }
  0x1c   :  { %1072 = vmatprep.subr.bf16.mxu0 %v1314_v8 }
  0x1f   :  { %1073 = vmatpush3.bf16.msra.mxu0 %v1314_v8 }
  0x20   :  { %1122 = vmatprep.subr.bf16.mxu0 %v1331_v17 }
  0x22   :  { %1075 = vmatmul.mubr.bf16.vlgmr.msra.gmra.mrb[0].mxu0 %v1316_v9 }
  0x23   :  { %1078 = vmatprep.mubr.bf16.mxu0 %v1317_v10  ;;  %1123 = vmatpush3.bf16.msra.mxu0 %v1331_v17 }
  0x24   :  { %1124 = vmatprep.subr.bf16.mxu0 %v1332_v18 }
  0x27   :  { %1125 = vmatpush3.bf16.msra.mxu0 %v1332_v18 }
  0x28   :  { %1126 = vmatprep.subr.bf16.mxu0 %v1333_v19 }
  0x2a   :  { %1079 = vmatmul.mubr.bf16.gmra.mrb[4].mxu0 %v1318_v11 }
  0x2b   :  { %1082 = vmatprep.mubr.bf16.mxu0 %v1319_v12  ;;  %1127 = vmatpush3.bf16.msra.mxu0 %v1333_v19 }
  0x2c   :  { %1128 = vmatprep.subr.bf16.mxu0 %v1334_v20 }
  0x2f   :  { %1129 = vmatpush3.bf16.msra.mxu0 %v1334_v20 }
  0x30   :  { %1130 = vmatprep.subr.bf16.mxu0 %v1335_v21 }
  0x32   :  { %1083 = vmatmul.mubr.bf16.gmra.mrb[8].mxu0 %v1320_v13 }
  0x33   :  { %1086 = vmatprep.mubr.bf16.mxu0 %v1321_v14  ;;  %1131 = vmatpush3.bf16.msra.mxu0 %v1335_v21 }
  0x34   :  { %1132 = vmatprep.subr.bf16.mxu0 %v1336_v22 }
  0x37   :  { %1133 = vmatpush3.bf16.msra.mxu0 %v1336_v22 }
  0x38   :  { %1134 = vmatprep.subr.bf16.mxu0 %v1337_v54 }
  0x3a   :  { %1087 = vmatmul.mubr.bf16.gmra.mrb[12].mxu0 %v1322_v15 }
  0x3b   :  { %1135 = vmatpush3.bf16.msra.mxu0 %v1337_v54 }
  0x3c   :  { %1136 = vmatprep.subr.bf16.mxu0 %v1338_v55 }
  0x3f   :  { %1137 = vmatpush3.bf16.msra.mxu0 %v1338_v55 }
  0xf5   :  { %v1076_v23 = vpop.f32.mrb[0].mxu0 }
  0xf6   :  { %v211_v24 = vpop.f32.mrb[1].mxu0 }
  0xf7   :  { %v1077_v25 = vpop.f32.mrb[2].mxu0 }
  0xf8   :  { %v275_v26 = vpack.c.bf16 %v1077_v25, %v1076_v23  ;;  %v214_v27 = vpop.f32.mrb[3].mxu0 }
  0xf9   :  { %v274_v28 = vpack.c.bf16 %v214_v27, %v211_v24 }
  0xfb   :  { %1090 = vmatprep.subr.bf16.mxu1 %v274_v28 }
  0xfc   :  { %1091 = vmatpush3.bf16.msra.mxu1 %v274_v28 }
  0xfd   :  { %v1080_v29 = vpop.f32.mrb[4].mxu0  ;;  %1092 = vmatprep.subr.bf16.mxu1 %v275_v26 }
  0xfe   :  { %v227_v30 = vpop.f32.mrb[5].mxu0 }
  0xff   :  { %v1081_v31 = vpop.f32.mrb[6].mxu0 }
 0x100   :  { %v277_v32 = vpack.c.bf16 %v1081_v31, %v1080_v29  ;;  %v230_v33 = vpop.f32.mrb[7].mxu0  ;;  %1093 = vmatpush3.bf16.msra.mxu1 %v275_v26 }
 0x101   :  { %v276_v34 = vpack.c.bf16 %v230_v33, %v227_v30 }
 0x103   :  { %1094 = vmatprep.subr.bf16.mxu1 %v276_v34 }
 0x104   :  { %1095 = vmatpush3.bf16.msra.mxu1 %v276_v34 }
 0x105   :  { %v1084_v35 = vpop.f32.mrb[8].mxu0  ;;  %1096 = vmatprep.subr.bf16.mxu1 %v277_v32 }
 0x106   :  { %v243_v36 = vpop.f32.mrb[9].mxu0 }
 0x107   :  { %v1085_v37 = vpop.f32.mrb[10].mxu0 }
 0x108   :  { %v279_v38 = vpack.c.bf16 %v1085_v37, %v1084_v35  ;;  %v246_v39 = vpop.f32.mrb[11].mxu0  ;;  %1097 = vmatpush3.bf16.msra.mxu1 %v277_v32 }
 0x109   :  { %v278_v40 = vpack.c.bf16 %v246_v39, %v243_v36 }
 0x10b   :  { %1098 = vmatprep.subr.bf16.mxu1 %v278_v40 }
 0x10c   :  { %1099 = vmatpush3.bf16.msra.mxu1 %v278_v40 }
 0x10d   :  { %v1088_v41 = vpop.f32.mrb[12].mxu0  ;;  %1100 = vmatprep.subr.bf16.mxu1 %v279_v38 }
 0x10e   :  { %v259_v42 = vpop.f32.mrb[13].mxu0 }
 0x10f   :  { %v1089_v43 = vpop.f32.mrb[14].mxu0 }
 0x110   :  { %v281_v44 = vpack.c.bf16 %v1089_v43, %v1088_v41  ;;  %v262_v45 = vpop.f32.mrb[15].mxu0  ;;  %1101 = vmatpush3.bf16.msra.mxu1 %v279_v38 }
 0x111   :  { %v280_v46 = vpack.c.bf16 %v262_v45, %v259_v42 }
 0x113   :  { %1102 = vmatprep.subr.bf16.mxu1 %v280_v46 }
 0x114   :  { %1103 = vmatpush3.bf16.msra.mxu1 %v280_v46 }
 0x115   :  { %1104 = vmatprep.subr.bf16.mxu1 %v281_v44 }
 0x118   :  { %1105 = vmatpush3.bf16.msra.mxu1 %v281_v44 }
 0x11b   :  { %1107 = vmatmul.mubr.bf16.vlgmr.msra.gmra.mrb[0].mxu1 %v1471_v47 }
 0x11c   :  { %1110 = vmatprep.mubr.bf16.mxu1 %v1476_v48 }
 0x123   :  { %1111 = vmatmul.mubr.bf16.gmra.mrb[4].mxu1 %v1483_v49 }
 0x124   :  { %1114 = vmatprep.mubr.bf16.mxu1 %v1488_v50 }
 0x12b   :  { %1115 = vmatmul.mubr.bf16.gmra.mrb[8].mxu1 %v1495_v51 }
 0x12c   :  { %1118 = vmatprep.mubr.bf16.mxu1 %v1500_v52 }
 0x133   :  { %1119 = vmatmul.mubr.bf16.gmra.mrb[12].mxu1 %v1507_v53 }
 0x134   :  { %1170 = vmatprep.mubr.bf16.mxu1 %v1447_v16 }
 0x1ee   :  { %v1108_v57 = vpop.f32.mrb[0].mxu1 }
 0x1ef   :  { %v380_v58 = vadd.f32 %v1108_v57, %v941_v56  ;;  %v371_v59 = vpop.f32.mrb[1].mxu1 }
 0x1f0   :  { %v372_v60 = vadd.f32 %v941_v56, %v371_v59  ;;  %v1109_v61 = vpop.f32.mrb[2].mxu1 }
 0x1f1   :  { %v383_v62 = vadd.f32 %v1109_v61, %v941_v56  ;;  %v374_v63 = vpop.f32.mrb[3].mxu1  ;;  %v436_v1 = vmax.f32 %v380_v58, 0.0 }
 0x1f2   :  { %v375_v0 = vadd.f32 %v941_v56, %v374_v63  ;;  %v434_v3 = vmax.f32 %v372_v60, 0.0 }
 0x1f3   :  { %v437_v2 = vmax.f32 %v383_v62, 0.0 }
 0x1f4   :  { %v435_v4 = vmax.f32 %v375_v0, 0.0 }
 0x1f5   :  { %v451_v5 = vpack.c.bf16 %v437_v2, %v436_v1 }
 0x1f6   :  { %v450_v6 = vpack.c.bf16 %v435_v4, %v434_v3  ;;  %v1112_v7 = vpop.f32.mrb[4].mxu1 }
 0x1f7   :  { %v396_v8 = vadd.f32 %v1112_v7, %v941_v56  ;;  %v387_v9 = vpop.f32.mrb[5].mxu1 }
 0x1f8   :  { %v388_v10 = vadd.f32 %v941_v56, %v387_v9  ;;  %v1113_v11 = vpop.f32.mrb[6].mxu1  ;;  %1138 = vmatprep.mubr.bf16.mxu0 %v450_v6 }
 0x1f9   :  { %v399_v12 = vadd.f32 %v1113_v11, %v941_v56  ;;  %v390_v13 = vpop.f32.mrb[7].mxu1  ;;  %1139 = vmatmul.mubr.bf16.vlgmr.msra.gmra.mrb[16].mxu0 %v451_v5  ;;  %v440_v15 = vmax.f32 %v396_v8, 0.0 }
 0x1fa   :  { %v391_v14 = vadd.f32 %v941_v56, %v390_v13  ;;  %v438_v17 = vmax.f32 %v388_v10, 0.0 }
 0x1fb   :  { %v441_v16 = vmax.f32 %v399_v12, 0.0 }
 0x1fc   :  { %v439_v18 = vmax.f32 %v391_v14, 0.0 }
 0x1fd   :  { %v453_v19 = vpack.c.bf16 %v441_v16, %v440_v15  ;;  %v1343_v16 = vmov 0.0|0.0  }
 0x1fe   :  { %v452_v20 = vpack.c.bf16 %v439_v18, %v438_v17  ;;  %v1116_v21 = vpop.f32.mrb[8].mxu1  ;;  %1256 = vmatprep.subr.bf16.mxu0 %v1343_v16  ;;  %v1345_v17 = vmov 0.0   ;;  %v823_v18 = vld [vmem:[%s1608_s7 + $0x28] sm:$0xff] }
 0x1ff   :  { %v412_v22 = vadd.f32 %v1116_v21, %v941_v56  ;;  %v403_v23 = vpop.f32.mrb[9].mxu1  ;;  %v825_v21 = vld [vmem:[%s1608_s7 + $0x38] sm:$0xff] }
 0x200   :  { %v404_v24 = vadd.f32 %v941_v56, %v403_v23  ;;  %v1117_v25 = vpop.f32.mrb[10].mxu1  ;;  %1142 = vmatprep.mubr.bf16.mxu0 %v452_v20  ;;  %v824_v20 = vld [vmem:[%s1608_s7 + $0x30] sm:$0xff]  ;;  %v826_v23 = vld [vmem:[%s1608_s7 + $0x40] sm:$0xff] }
 0x201   :  { %v415_v26 = vadd.f32 %v1117_v25, %v941_v56  ;;  %v406_v27 = vpop.f32.mrb[11].mxu1  ;;  %1143 = vmatmul.mubr.bf16.gmra.mrb[20].mxu0 %v453_v19  ;;  %v444_v29 = vmax.f32 %v412_v22, 0.0  ;;  %v1290_v22 = vpack.c.bf16 %v825_v21, %v824_v20 }
 0x202   :  { %v407_v28 = vadd.f32 %v941_v56, %v406_v27  ;;  %v442_v31 = vmax.f32 %v404_v24, 0.0  ;;  %v827_v24 = vld [vmem:[%s1608_s7 + $0x48] sm:$0xff]  ;;  %v829_v27 = vld [vmem:[%s1608_s7 + $0x58] sm:$0xff] }
 0x203   :  { %v445_v30 = vmax.f32 %v415_v26, 0.0  ;;  %v1293_v25 = vpack.c.bf16 %v827_v24, %v826_v23  ;;  %v828_v26 = vld [vmem:[%s1608_s7 + $0x50] sm:$0xff] }
 0x204   :  { %v443_v32 = vmax.f32 %v407_v28, 0.0  ;;  %v1296_v28 = vpack.c.bf16 %v829_v27, %v828_v26 }
 0x205   :  { %v455_v33 = vpack.c.bf16 %v445_v30, %v444_v29  ;;  %v830_v29 = vld [vmem:[%s1608_s7 + $0x60] sm:$0xff]  ;;  %v831_v30 = vld [vmem:[%s1608_s7 + $0x68] sm:$0xff] }
 0x206   :  { %v454_v34 = vpack.c.bf16 %v443_v32, %v442_v31  ;;  %v1120_v35 = vpop.f32.mrb[12].mxu1  ;;  %v1299_v31 = vpack.c.bf16 %v831_v30, %v830_v29  ;;  %v832_v32 = vld [vmem:[%s1608_s7 + $0x70] sm:$0xff]  ;;  %v747_v29 = vld [vmem:[%s1610_s2] sm:$0xff] }
 0x207   :  { %v428_v36 = vadd.f32 %v1120_v35, %v941_v56  ;;  %v419_v37 = vpop.f32.mrb[13].mxu1  ;;  %v958_v35 = vld [vmem:[%s1609_s6] ss:$0 sm:$0xff] }
 0x208   :  { %v420_v38 = vadd.f32 %v941_v56, %v419_v37  ;;  %v1121_v39 = vpop.f32.mrb[14].mxu1  ;;  %1146 = vmatprep.mubr.bf16.mxu0 %v454_v34 }
 0x209   :  { %v431_v40 = vadd.f32 %v1121_v39, %v941_v56  ;;  %v422_v41 = vpop.f32.mrb[15].mxu1  ;;  %1147 = vmatmul.mubr.bf16.gmra.mrb[24].mxu0 %v455_v33  ;;  %v448_v43 = vmax.f32 %v428_v36, 0.0  ;;  %v833_v33 = vld [vmem:[%s1608_s7 + $0x78] sm:$0xff] }
 0x20a   :  { %v423_v42 = vadd.f32 %v941_v56, %v422_v41  ;;  %v446_v45 = vmax.f32 %v420_v38, 0.0  ;;  %v1302_v34 = vpack.c.bf16 %v833_v33, %v832_v32  ;;  %v959_v32 = vld [vmem:[%s1611_s8] ss:$0 sm:$0xff] }
 0x20b   :  { %v449_v44 = vmax.f32 %v431_v40, 0.0 }
 0x20c   :  { %v447_v46 = vmax.f32 %v423_v42, 0.0 }
 0x20d   :  { %v457_v54 = vpack.c.bf16 %v449_v44, %v448_v43 }
 0x20e   :  { %v456_v55 = vpack.c.bf16 %v447_v46, %v446_v45 }
 0x210   :  { %1150 = vmatprep.mubr.bf16.mxu0 %v456_v55 }
 0x211   :  { %1151 = vmatmul.mubr.bf16.gmra.mrb[28].mxu0 %v457_v54 }
 0x212   :  { %1218 = vmatprep.mubr.msk.f32.mxu0 %vm1344_vm0, %v1345_v17 }
 0x2cc   :  { %v1140_v57 = vpop.f32.mrb[16].mxu0 }
 0x2cd   :  { %v556_v58 = vpop.f32.mrb[17].mxu0 }
 0x2ce   :  { %v1141_v59 = vpop.f32.mrb[18].mxu0 }
 0x2cf   :  { %v620_v60 = vpack.c.bf16 %v1141_v59, %v1140_v57  ;;  %v559_v61 = vpop.f32.mrb[19].mxu0 }
 0x2d0   :  { %v619_v62 = vpack.c.bf16 %v559_v61, %v556_v58 }
 0x2d2   :  { %1154 = vmatprep.subr.bf16.mxu1 %v619_v62 }
 0x2d3   :  { %1155 = vmatpush3.bf16.msra.mxu1 %v619_v62 }
 0x2d4   :  { %v1144_v63 = vpop.f32.mrb[20].mxu0  ;;  %1156 = vmatprep.subr.bf16.mxu1 %v620_v60 }
 0x2d5   :  { %v572_v0 = vpop.f32.mrb[21].mxu0 }
 0x2d6   :  { %v1145_v56 = vpop.f32.mrb[22].mxu0 }
 0x2d7   :  { %v622_v1 = vpack.c.bf16 %v1145_v56, %v1144_v63  ;;  %v575_v2 = vpop.f32.mrb[23].mxu0  ;;  %1157 = vmatpush3.bf16.msra.mxu1 %v620_v60 }
 0x2d8   :  { %v621_v3 = vpack.c.bf16 %v575_v2, %v572_v0 }
 0x2da   :  { %1158 = vmatprep.subr.bf16.mxu1 %v621_v3 }
 0x2db   :  { %1159 = vmatpush3.bf16.msra.mxu1 %v621_v3 }
 0x2dc   :  { %v1148_v4 = vpop.f32.mrb[24].mxu0  ;;  %1160 = vmatprep.subr.bf16.mxu1 %v622_v1 }
 0x2dd   :  { %v588_v5 = vpop.f32.mrb[25].mxu0 }
 0x2de   :  { %v1149_v6 = vpop.f32.mrb[26].mxu0 }
 0x2df   :  { %v624_v7 = vpack.c.bf16 %v1149_v6, %v1148_v4  ;;  %v591_v8 = vpop.f32.mrb[27].mxu0  ;;  %1161 = vmatpush3.bf16.msra.mxu1 %v622_v1 }
 0x2e0   :  { %v623_v9 = vpack.c.bf16 %v591_v8, %v588_v5 }
 0x2e2   :  { %1162 = vmatprep.subr.bf16.mxu1 %v623_v9 }
 0x2e3   :  { %1163 = vmatpush3.bf16.msra.mxu1 %v623_v9 }
 0x2e4   :  { %v1152_v10 = vpop.f32.mrb[28].mxu0  ;;  %1164 = vmatprep.subr.bf16.mxu1 %v624_v7 }
 0x2e5   :  { %v604_v11 = vpop.f32.mrb[29].mxu0 }
 0x2e6   :  { %v1153_v12 = vpop.f32.mrb[30].mxu0 }
 0x2e7   :  { %v626_v13 = vpack.c.bf16 %v1153_v12, %v1152_v10  ;;  %v607_v14 = vpop.f32.mrb[31].mxu0  ;;  %1165 = vmatpush3.bf16.msra.mxu1 %v624_v7 }
 0x2e8   :  { %v625_v15 = vpack.c.bf16 %v607_v14, %v604_v11 }
 0x2ea   :  { %1166 = vmatprep.subr.bf16.mxu1 %v625_v15 }
 0x2eb   :  { %1167 = vmatpush3.bf16.msra.mxu1 %v625_v15 }
 0x2ec   :  { %1168 = vmatprep.subr.bf16.mxu1 %v626_v13 }
 0x2ef   :  { %1169 = vmatpush3.bf16.msra.mxu1 %v626_v13 }
 0x2f0   :  { %1280 = vmatprep.subr.bf16.mxu1 %v1343_v16 }
 0x2f2   :  { %1171 = vmatmul.mubr.bf16.vlgmr.msra.gmra.mrb[16].mxu1 %v1471_v47  ;;  %v818_v47 = vld [vmem:[%s1608_s7] sm:$0xff] }
 0x2f3   :  { %1174 = vmatprep.mubr.bf16.mxu1 %v1476_v48  ;;  %v819_v48 = vld [vmem:[%s1608_s7 + $0x8] sm:$0xff] }
 0x2fa   :  { %1175 = vmatmul.mubr.bf16.gmra.mrb[20].mxu1 %v1483_v49  ;;  %v820_v49 = vld [vmem:[%s1608_s7 + $0x10] sm:$0xff] }
 0x2fb   :  { %1178 = vmatprep.mubr.bf16.mxu1 %v1488_v50  ;;  %v1281_v50 = vpack.c.bf16 %v819_v48, %v818_v47 }
 0x2fd   :  { %1282 = vmatpush3.bf16.msra.mxu1 %v1281_v50 }
 0x2fe   :  { %1283 = vmatprep.subr.bf16.mxu1 %v1343_v16 }
 0x302   :  { %1179 = vmatmul.mubr.bf16.gmra.mrb[24].mxu1 %v1495_v51  ;;  %v821_v51 = vld [vmem:[%s1608_s7 + $0x18] sm:$0xff] }
 0x303   :  { %1182 = vmatprep.mubr.bf16.mxu1 %v1500_v52  ;;  %v1284_v52 = vpack.c.bf16 %v821_v51, %v820_v49 }
 0x305   :  { %1285 = vmatpush3.bf16.msra.mxu1 %v1284_v52 }
 0x306   :  { %1286 = vmatprep.subr.bf16.mxu1 %v1343_v16 }
 0x30a   :  { %1183 = vmatmul.mubr.bf16.gmra.mrb[28].mxu1 %v1507_v53  ;;  %v822_v53 = vld [vmem:[%s1608_s7 + $0x20] sm:$0xff] }
 0x30b   :  { %1253 = vmatprep.mubr.msk.f32.mxu1 %vm1344_vm0, %v1345_v17  ;;  %v1287_v19 = vpack.c.bf16 %v823_v18, %v822_v53 }
 0x30d   :  { %1288 = vmatpush3.bf16.msra.mxu1 %v1287_v19 }
 0x30e   :  { %1289 = vmatprep.subr.bf16.mxu1 %v1343_v16 }
 0x311   :  { %1291 = vmatpush3.bf16.msra.mxu1 %v1290_v22 }
 0x312   :  { %1292 = vmatprep.subr.bf16.mxu1 %v1343_v16 }
 0x315   :  { %1294 = vmatpush3.bf16.msra.mxu1 %v1293_v25 }
 0x316   :  { %1295 = vmatprep.subr.bf16.mxu1 %v1343_v16 }
 0x319   :  { %1297 = vmatpush3.bf16.msra.mxu1 %v1296_v28 }
 0x31a   :  { %1298 = vmatprep.subr.bf16.mxu1 %v1343_v16 }
 0x31d   :  { %1300 = vmatpush3.bf16.msra.mxu1 %v1299_v31 }
 0x31e   :  { %1301 = vmatprep.subr.bf16.mxu1 %v1343_v16 }
 0x321   :  { %1303 = vmatpush3.bf16.msra.mxu1 %v1302_v34 }
 0x3c5   :  { %v1172_v36 = vpop.f32.mrb[16].mxu1 }
 0x3c6   :  { %v677_v37 = vadd.f32 %v1172_v36, %v958_v35  ;;  %v668_v38 = vpop.f32.mrb[17].mxu1 }
 0x3c7   :  { %v669_v39 = vadd.f32 %v958_v35, %v668_v38  ;;  %v1173_v40 = vpop.f32.mrb[18].mxu1 }
 0x3c8   :  { %v680_v41 = vadd.f32 %v1173_v40, %v958_v35  ;;  %v671_v42 = vpop.f32.mrb[19].mxu1  ;;  %v733_v44 = vmax.f32 %v677_v37, 0.0 }
 0x3c9   :  { %v672_v43 = vadd.f32 %v958_v35, %v671_v42  ;;  %v731_v46 = vmax.f32 %v669_v39, 0.0 }
 0x3ca   :  { %v734_v45 = vmax.f32 %v680_v41, 0.0 }
 0x3cb   :  { %v732_v54 = vmax.f32 %v672_v43, 0.0 }
 0x3cc   :  { %v1260_v55 = vpack.c.bf16 %v734_v45, %v733_v44 }
 0x3cd   :  { %v1257_v57 = vpack.c.bf16 %v732_v54, %v731_v46  ;;  %v1176_v58 = vpop.f32.mrb[20].mxu1 }
 0x3ce   :  { %v693_v59 = vadd.f32 %v1176_v58, %v958_v35  ;;  %v684_v60 = vpop.f32.mrb[21].mxu1 }
 0x3cf   :  { %v685_v61 = vadd.f32 %v958_v35, %v684_v60  ;;  %v1177_v62 = vpop.f32.mrb[22].mxu1  ;;  %1258 = vmatpush3.bf16.msra.mxu0 %v1257_v57 }
 0x3d0   :  { %v696_v63 = vadd.f32 %v1177_v62, %v958_v35  ;;  %v687_v0 = vpop.f32.mrb[23].mxu1  ;;  %1259 = vmatprep.subr.bf16.mxu0 %v1343_v16  ;;  %v737_v1 = vmax.f32 %v693_v59, 0.0 }
 0x3d1   :  { %v688_v56 = vadd.f32 %v958_v35, %v687_v0  ;;  %v735_v3 = vmax.f32 %v685_v61, 0.0 }
 0x3d2   :  { %v738_v2 = vmax.f32 %v696_v63, 0.0 }
 0x3d3   :  { %v736_v4 = vmax.f32 %v688_v56, 0.0  ;;  %1261 = vmatpush3.bf16.msra.mxu0 %v1260_v55 }
 0x3d4   :  { %v1266_v5 = vpack.c.bf16 %v738_v2, %v737_v1  ;;  %1262 = vmatprep.subr.bf16.mxu0 %v1343_v16 }
 0x3d5   :  { %v1263_v6 = vpack.c.bf16 %v736_v4, %v735_v3  ;;  %v1180_v7 = vpop.f32.mrb[24].mxu1 }
 0x3d6   :  { %v709_v8 = vadd.f32 %v1180_v7, %v958_v35  ;;  %v700_v9 = vpop.f32.mrb[25].mxu1 }
 0x3d7   :  { %v701_v10 = vadd.f32 %v958_v35, %v700_v9  ;;  %v1181_v11 = vpop.f32.mrb[26].mxu1  ;;  %1264 = vmatpush3.bf16.msra.mxu0 %v1263_v6 }
 0x3d8   :  { %v712_v12 = vadd.f32 %v1181_v11, %v958_v35  ;;  %v703_v13 = vpop.f32.mrb[27].mxu1  ;;  %1265 = vmatprep.subr.bf16.mxu0 %v1343_v16  ;;  %v741_v15 = vmax.f32 %v709_v8, 0.0 }
 0x3d9   :  { %v704_v14 = vadd.f32 %v958_v35, %v703_v13  ;;  %v739_v47 = vmax.f32 %v701_v10, 0.0 }
 0x3da   :  { %v742_v17 = vmax.f32 %v712_v12, 0.0 }
 0x3db   :  { %v740_v48 = vmax.f32 %v704_v14, 0.0  ;;  %1267 = vmatpush3.bf16.msra.mxu0 %v1266_v5 }
 0x3dc   :  { %v1272_v49 = vpack.c.bf16 %v742_v17, %v741_v15  ;;  %1268 = vmatprep.subr.bf16.mxu0 %v1343_v16 }
 0x3dd   :  { %v1269_v50 = vpack.c.bf16 %v740_v48, %v739_v47  ;;  %v1184_v51 = vpop.f32.mrb[28].mxu1 }
 0x3de   :  { %v725_v52 = vadd.f32 %v1184_v51, %v958_v35  ;;  %v716_v53 = vpop.f32.mrb[29].mxu1 }
 0x3df   :  { %v717_v18 = vadd.f32 %v958_v35, %v716_v53  ;;  %v1185_v19 = vpop.f32.mrb[30].mxu1  ;;  %1270 = vmatpush3.bf16.msra.mxu0 %v1269_v50 }
 0x3e0   :  { %v728_v20 = vadd.f32 %v1185_v19, %v958_v35  ;;  %v719_v21 = vpop.f32.mrb[31].mxu1  ;;  %1271 = vmatprep.subr.bf16.mxu0 %v1343_v16  ;;  %v745_v23 = vmax.f32 %v725_v52, 0.0 }
 0x3e1   :  { %v720_v22 = vadd.f32 %v958_v35, %v719_v21  ;;  %v743_v25 = vmax.f32 %v717_v18, 0.0 }
 0x3e2   :  { %v746_v24 = vmax.f32 %v728_v20, 0.0 }
 0x3e3   :  { %v744_v26 = vmax.f32 %v720_v22, 0.0  ;;  %1273 = vmatpush3.bf16.msra.mxu0 %v1272_v49 }
 0x3e4   :  { %v1278_v27 = vpack.c.bf16 %v746_v24, %v745_v23  ;;  %1274 = vmatprep.subr.bf16.mxu0 %v1343_v16 }
 0x3e5   :  { %v1275_v28 = vpack.c.bf16 %v744_v26, %v743_v25 }
 0x3e7   :  { %1276 = vmatpush3.bf16.msra.mxu0 %v1275_v28 }
 0x3e8   :  { %1277 = vmatprep.subr.bf16.mxu0 %v1343_v16 }
 0x3eb   :  { %1279 = vmatpush3.bf16.msra.mxu0 %v1278_v27 }
 0x3ee   :  { %1219 = vmatmul.mubr.f32.vlgmr.msra.gmra.mrb[32].mxu0 %v747_v29 }
 0x4c1   :  { %v814_v30 = vpop.f32.mrb[32].mxu0 }
 0x4c2   :  { %v1220_v31 = vpop.f32.mrb[33].mxu0  ;;  %1254 = vmatmul.mubr.f32.vlgmr.msra.gmra.mrb[32].mxu1 %v814_v30 }
 0x595   :  { %v907_v33 = vpop.f32.mrb[32].mxu1 }
 0x596   :  { %v908_v34 = vadd.f32 %v959_v32, %v907_v33  ;;  %v1255_v35 = vpop.f32.mrb[33].mxu1 }
 0x598   :  { %911 = vmax.xlane.f32.xlu0 %v908_v34 }
 0x625   :  { %v912_v36 = vpop.xlane.xlu0 %911 }
 0x626   :  { %v913_v37 = vsub.f32 %v908_v34, %v912_v36 }
 0x628   :  { %v914_v16 = vmul.f32 1.442695, %v913_v37 }
 0x62a   :  { %1339 = vpow2.f32 %v914_v16 }
 0x634   :  { %v1340_v38 = vpop.eup %1339 }
 0x635   :  { %916 = vadd.xlane.f32.xlu0 %v1340_v38 }
 0x6c2   :  { %v917_v39 = vpop.xlane.xlu0 %916 }
 0x6c3   :  { %1341 = vrcp.f32 %v917_v39 }
 0x6cd   :  { %v1342_v40 = vpop.eup %1341 }
 0x6ce   :  { %v919_v41 = vmul.f32 %v1342_v40, %v1340_v38 }
 0x6d0   :  { %920 = vst [vmem:[%s1612_s9] sm:$0xff] %v919_v41 }

</bundles_post_ra>
